<compile_context>
chip_gen: v7x
topology: tpu7x:2x2x1
jax: 0.10.0
libtpu: 0.0.40
codegen_flags: <defaults>
</compile_context>

<pallas_src>
import functools
import math

import jax
import jax.numpy as jnp
from jax.experimental import pallas as pl
from jax.experimental.pallas import tpu as pltpu


def _cdiv(a, b):
    return -(-a // b)


def _pe_kernel(a_ref, b_ref, o_ref):
    """One (tile_r, w) tile of the lane-folded sinusoidal PE table.

    out[r, c] = sin((row0 + r) * a[c] + b[c])
    with a[c] = fold * freq(c), b[c] = pos_off(c) * freq(c) + phase(c)
    (phase = pi/2 on odd feature columns so the same sin also covers cos).
    row0*a is folded into the offset once per tile (a single (1, w) fma), so
    the per-element work is one fma + one sin.
    """
    tile_r, w = o_ref.shape
    a = a_ref[...]
    row0 = (pl.program_id(0) * tile_r).astype(jnp.float32)
    bt = row0 * a + b_ref[...]                                  # (1, w)
    r = jax.lax.broadcasted_iota(jnp.int32, (tile_r, w), 0).astype(jnp.float32)
    o_ref[...] = jnp.sin(r * a + bt).astype(o_ref.dtype)


def _column_tables(d_model, fold):
    """Per-column scale/offset for the lane-folded (rows, fold*d_model) layout."""
    w = fold * d_model
    j = jnp.arange(w, dtype=jnp.int32)
    col = j % d_model                                    # feature index
    pos_off = (j // d_model).astype(jnp.float32)         # row offset inside fold
    even_col = (col - (col % 2)).astype(jnp.float32)     # 2*(col//2)
    freq = jnp.exp(even_col * (-(math.log(10000.0) / float(d_model))))
    phase = jnp.where((col % 2) == 0, 0.0, math.pi / 2.0).astype(jnp.float32)
    a = (float(fold) * freq).astype(jnp.float32)
    b = (pos_off * freq + phase).astype(jnp.float32)
    return a[None, :], b[None, :]


def _device_kind():
    try:
        return jax.devices()[0].device_kind.lower()
    except Exception:
        return ""


def _num_tensorcores():
    """Best-effort TensorCores-per-device query (2 on v7x, 1 on v5e/v6e)."""
    try:
        dev = jax.devices()[0]
        for attr in ("num_cores", "core_count"):
            v = getattr(dev, attr, None)
            if v:
                return int(v)
    except Exception:
        pass
    return 1


@functools.lru_cache(maxsize=32)
def _pe_table(seq_len, d_model, out_dtype=jnp.float32, tile_bytes_cap=None):
    """Builds the (seq_len, d_model) PE table with a single pallas_call."""
    assert d_model % 2 == 0, "d_model must be even (as in the PyTorch module)"

    itemsize = jnp.finfo(out_dtype).bits // 8
    sub = 8 * (4 // itemsize)                  # sublane multiple: 8 f32, 16 bf16

    # Lane-dense fold: pack `fold` consecutive sequence rows into lanes so the
    # kernel's last dim is a multiple of 128 (unmasked stores).  Kept even when
    # seq_len % fold != 0: rows is rounded up and the tail is sliced off below.
    fold = 128 // math.gcd(d_model, 128)
    w = fold * d_model                         # == lcm(d_model, 128)
    rows = _cdiv(seq_len, fold)

    # Byte-budget tile sizing.  Default scoped VMEM: 16 MiB on v5e (and older),
    # 32 MiB on v6e/v7x; the output is double-buffered, so keep 2*tile within
    # that with headroom.  (v7x's smaller 64 MiB *physical* VMEM is not the
    # binding limit here.)
    if tile_bytes_cap is None:
        kind = _device_kind()
        newer = ("v6" in kind) or ("v7" in kind) or ("tpu7" in kind)
        tile_bytes_cap = (8 << 20) if newer else (6 << 20)

    bytes_per_row = w * itemsize
    tile_r_cap = max(sub, (tile_bytes_cap // bytes_per_row) // sub * sub)
    tile_r = min(rows, tile_r_cap)
    if tile_r < rows:
        tile_r = max(sub, (tile_r // sub) * sub)
        grid_r = _cdiv(rows, tile_r)
        # Rebalance so the last tile is not mostly padding (sliced-off waste).
        tile_r = _cdiv(_cdiv(rows, grid_r), sub) * sub
        grid_r = _cdiv(rows, tile_r)
    else:
        grid_r = 1                              # single full-array block
    rows_padded = grid_r * tile_r

    a_col, b_col = _column_tables(d_model, fold)

    def build(dim_sem):
        return pl.pallas_call(
            _pe_kernel,
            out_shape=jax.ShapeDtypeStruct((rows_padded, w), out_dtype),
            grid=(grid_r,),
            in_specs=[
                pl.BlockSpec((1, w), lambda i: (0, 0)),
                pl.BlockSpec((1, w), lambda i: (0, 0)),
            ],
            out_specs=pl.BlockSpec((tile_r, w), lambda i: (i, 0)),
            compiler_params=pltpu.CompilerParams(dimension_semantics=dim_sem),
        )(a_col, b_col)

    if _num_tensorcores() > 1 and grid_r > 1:
        # v7x: split row tiles across both TensorCores.
        try:
            pe = build((pltpu.CORE_PARALLEL,))
        except Exception:
            pe = build(("parallel",))
    else:
        pe = build(("parallel",))

    # Un-fold lanes back to (positions, d_model) and drop padded tail positions.
    pe = pe.reshape(rows_padded * fold, d_model)[:seq_len]
    return pe


def positional_embedding(x, d_model, *, out_dtype=jnp.float32):
    """Pallas equivalent of PositionalEmbedding.forward(x) -> (1, L, d_model).

    The table is cached per (seq_len, d_model, dtype) -- like register_buffer --
    so the kernel stays out of the steady-state forward path.  Pass
    out_dtype=jnp.bfloat16 when the consuming model runs bf16 (halves HBM
    writeback and the cached table footprint).
    """
    seq_len = x.shape[1]
    return _pe_table(seq_len, d_model, out_dtype)[None]


def _reference_pe(seq_len, d_model):
    """Pure-JAX replica of the PyTorch __init__ buffer, sliced to seq_len."""
    position = jnp.arange(0, seq_len, dtype=jnp.float32)[:, None]
    div_term = jnp.exp(
        jnp.arange(0, d_model, 2, dtype=jnp.float32)
        * (-(math.log(10000.0) / d_model))
    )
    pe = jnp.zeros((seq_len, d_model), jnp.float32)
    pe = pe.at[:, 0::2].set(jnp.sin(position * div_term))
    pe = pe.at[:, 1::2].set(jnp.cos(position * div_term))
    return pe[None]


if __name__ == "__main__":
    key = jax.random.PRNGKey(0)

    # Primary (small) case matching the module's forward contract.
    batch, seq_len, d_model = 2, 8, 32
    x = jax.random.normal(key, (batch, seq_len, d_model), dtype=jnp.float32)

    out = jax.block_until_ready(positional_embedding(x, d_model))
    ref = _reference_pe(seq_len, d_model)
    assert out.shape == (1, seq_len, d_model), out.shape
    assert jnp.allclose(out, ref, atol=1e-4, rtol=1e-4), "mismatch vs reference"

    # Lane-folding kept even when seq_len % fold != 0 (padded tail sliced off).
    out2 = jax.block_until_ready(
        positional_embedding(jnp.zeros((1, 50, 48), jnp.float32), 48)
    )
    assert out2.shape == (1, 50, 48), out2.shape
    assert jnp.allclose(out2, _reference_pe(50, 48), atol=1e-4, rtol=1e-4)

    # Multi-tile (grid > 1) path with byte-budget sizing + rebalanced tiles
    # (tile cap forced small so the grid path is actually exercised).
    pe3 = jax.block_until_ready(
        _pe_table(1040, 64, jnp.float32, tile_bytes_cap=64 << 10)
    )
    # Looser tolerance: at large angles the folded algebra rounds differently
    # from position*div_term (both are a few f32 ulps off the true value).
    assert jnp.allclose(pe3[None], _reference_pe(1040, 64), atol=1e-3, rtol=1e-3)

    # bf16 table path (halves HBM writeback on write-roofline-bound parts).
    out4 = jax.block_until_ready(
        positional_embedding(x, d_model, out_dtype=jnp.bfloat16)
    )
    assert out4.dtype == jnp.bfloat16
    assert jnp.allclose(out4.astype(jnp.float32), ref, atol=1e-2, rtol=1e-2)

    print("KERNEL_OK")
</pallas_src>

<mosaic_0001>
module attributes {stable_mosaic.version = 11 : i64} {
  func.func @_pe_kernel(%arg0: i32, %arg1: memref<1x128xf32, #tpu.memory_space<vmem>>, %arg2: memref<1x128xf32, #tpu.memory_space<vmem>>, %arg3: memref<2x128xf32, #tpu.memory_space<vmem>>) attributes {dimension_semantics = [#tpu.dimension_semantics<parallel>], iteration_bounds = array<i64: 1>, scalar_prefetch = 0 : i64, scratch_operands = 0 : i64, tpu.core_type = #tpu.core_type<tc>, window_params = [{pipeline_mode = #tpu.pipeline_mode<synchronous>, transform_indices = @transform_0, window_bounds = array<i64: 1, 128>}, {pipeline_mode = #tpu.pipeline_mode<synchronous>, transform_indices = @transform_1, window_bounds = array<i64: 1, 128>}, {transform_indices = @transform_2, window_bounds = array<i64: 2, 128>}]} {
    %c0 = arith.constant 0 : index
    %c0_0 = arith.constant 0 : index
    %0 = vector.load %arg1[%c0, %c0_0] : memref<1x128xf32, #tpu.memory_space<vmem>>, vector<1x128xf32>
    %c2_i32 = arith.constant 2 : i32
    %1 = arith.muli %arg0, %c2_i32 : i32
    %2 = arith.sitofp %1 : i32 to f32
    %3 = vector.broadcast %2 : f32 to vector<1x128xf32>
    %4 = arith.mulf %3, %0 : vector<1x128xf32>
    %c0_1 = arith.constant 0 : index
    %c0_2 = arith.constant 0 : index
    %5 = vector.load %arg2[%c0_1, %c0_2] : memref<1x128xf32, #tpu.memory_space<vmem>>, vector<1x128xf32>
    %6 = arith.addf %4, %5 : vector<1x128xf32>
    %7 = tpu.iota {dimensions = array<i32: 0>} : vector<2x128xi32>
    %8 = arith.sitofp %7 : vector<2x128xi32> to vector<2x128xf32>
    %9 = vector.broadcast %0 : vector<1x128xf32> to vector<2x128xf32>
    %10 = arith.mulf %8, %9 : vector<2x128xf32>
    %11 = vector.broadcast %6 : vector<1x128xf32> to vector<2x128xf32>
    %12 = arith.addf %10, %11 : vector<2x128xf32>
    %13 = math.sin %12 : vector<2x128xf32>
    %c0_3 = arith.constant 0 : index
    %c0_4 = arith.constant 0 : index
    %14 = vector.load %arg3[%c0_3, %c0_4] : memref<2x128xf32, #tpu.memory_space<vmem>>, vector<2x128xf32>
    tpu.vector_store %arg3[%c0_3, %c0_4], %13 {strides = array<i32>} : memref<2x128xf32, #tpu.memory_space<vmem>>, vector<2x128xf32>,
    return
  }
  func.func @transform_0(%arg0: i32) -> (i32, i32) {
    %c0_i32 = arith.constant 0 : i32
    %c0_i32_0 = arith.constant 0 : i32
    %c0_i32_1 = arith.constant 0 : i32
    return %c0_i32, %c0_i32_0 : i32, i32
  }
  func.func @transform_1(%arg0: i32) -> (i32, i32) {
    %c0_i32 = arith.constant 0 : i32
    %c0_i32_0 = arith.constant 0 : i32
    %c0_i32_1 = arith.constant 0 : i32
    return %c0_i32, %c0_i32_0 : i32, i32
  }
  func.func @transform_2(%arg0: i32) -> (i32, i32) {
    %c0_i32 = arith.constant 0 : i32
    %c0_i32_0 = arith.constant 0 : i32
    return %arg0, %c0_i32 : i32, i32
  }
}

</mosaic_0001>

<bundles_post_ra>
// kernel: tpu_custom_call.1
= control target key start
LH: loop header
LB: loop body
LE: loop exit
PB: predicated region body
PF: predicated region fallthrough
CT: control target
= control target key end

     0   :  { %7 = vsyncpa [#allocation3], 0  ;;  %s307_s0 = inlined_call_operand.hbm [shape: f32[1,128], index: 0, kind: input, shape index: {}]   ;;  %s308_s1 = inlined_call_operand.vmem [shape: f32[1,128], index: 1, kind: input, shape index: {}]   ;;  %s309_s2 = inlined_call_operand.hbm [shape: f32[2,128], index: 2, kind: output, shape index: {}]  }
   0x1   :  { %8 = vsyncpa [#allocation4], 0  ;;  %s236_s9 = smov [#allocation2]   ;;  %s188_s13 = scalar_lea.hbm %s307_s0, 16 }
   0x2   :  { %s15_s10 = sshll.u32 %s236_s9, 4  ;;  %p189_p0 = scmp.ne.s32.totalorder %s307_s0, %s188_s13  ;;  %s16_s10 = int_to_ptr.vmem [resolvable:$true] %s15_s10 }
   0x3   :  { %p192_p1 = scmp.lt.u32.totalorder %s188_s13, %s307_s0 }
   0x5   :  { %p194_p2 = pnand %p192_p1, %p189_p0 }
   0x7   :  { %197 = shalt.err (!%p194_p2)
}
   0x8   :  { %s198_s18 = scalar_lea.vmem %s16_s10, 16  ;;  %s202_s19 = scalar_lea.vmem %s16_s10, 32 }
   0x9   :  { %p199_p3 = scmp.ne.s32.totalorder %s16_s10, %s198_s18  ;;  %p203_p4 = scmp.lt.s32.totalorder %s16_s10, %s16_s10 }
   0xa   :  { %p204_p5 = scmp.lt.s32.totalorder %s202_s19, %s198_s18 }
   0xc   :  { %p205_p6 = por %p204_p5, %p203_p4 }
   0xe   :  { %p206_p7 = pnand %p205_p6, %p199_p3 }
  0x10   :  { %209 = shalt.err (!%p206_p7)
}
  0x11   :  { %18 = dma.hbm_to_vmem [thread:$0]  %s307_s0, 16, %s16_s10, [#allocation3]  }
  0x12   :  { %232 = dma.done.wait [#allocation3], 16  }
  0x13   :  { %233 = vsyncadd [#allocation3], 4294967280  ;;  %v31_v0 = vlaneseq  ;;  %v24_v4 = vld [vmem:[#allocation2] sm:$0x1]  ;;  %v237_v23 = vmov 683565275  }
  0x14   :  { %v29_v5 = vld [vmem:[%s308_s1] sm:$0x1]  ;;  %v28_v6 = vmul.f32 0.0, %v24_v4  ;;  %v238_v25 = vmov 2475754826   ;;  %s243_s0 = smov [#allocation5]  }
  0x15   :  { %v32_v1 = vshrl.u32 %v31_v0, 7  ;;  %v239_v27 = vmov 2131351028   ;;  %v240_v29 = vmov 2102212464   ;;  %s159_s1 = sshll.u32 %s243_s0, 4  ;;  %s160_s1 = int_to_ptr.vmem [resolvable:$true] %s159_s1 }
  0x16   :  { %v30_v8 = vadd.f32 %v29_v5, %v28_v6  ;;  %v241_v31 = vmov 920167782   ;;  %v242_v38 = vmov 1326507024   ;;  %s210_s24 = scalar_lea.vmem %s160_s1, 32  ;;  %p215_p9 = scmp.lt.s32.totalorder %s160_s1, %s160_s1 }
  0x17   :  { %v37_v2 = vsub.s32 0, %v32_v1  ;;  %v33_v3 = vcvt.s32.f32 %v32_v1  ;;  %p211_p8 = scmp.ne.s32.totalorder %s160_s1, %s210_s24  ;;  %p216_p10 = scmp.lt.s32.totalorder %s210_s24, %s210_s24 }
  0x19   :  { %v38_v7 = vrot.slane %v24_v4, %v37_v2  ;;  %v45_v10 = vrot.slane %v30_v8, %v37_v2  ;;  %p217_p11 = por %p216_p10, %p215_p9 }
  0x1b   :  { %v40_v9 = vmul.f32 %v38_v7, %v33_v3  ;;  %p218_p12 = pnand %p217_p11, %p211_p8 }
  0x1d   :  { %v274_v11 = vadd.f32 %v45_v10, %v40_v9 }
  0x1f   :  { %v51_v12 = vand.u32 2139095040, %v274_v11  ;;  %v48_v14 = vand.u32 2147483647, %v274_v11  ;;  %vm50_vm7 = vcmp.lt.s32.totalorder %v274_v11, 0  ;;  %vm140_vm12 = vweird.f32 %v274_v11 }
  0x21   :  { %v52_v13 = vshrl.u32 %v51_v12, 23  ;;  %v55_v17 = vand.u32 8388607, %v48_v14  ;;  %vm49_vm8 = vcmp.le.f32.partialorder %v48_v14, 0.7853982 }
  0x23   :  { %v168_v15 = vadd.s32 4294967169, %v52_v13  ;;  %v56_v20 = vor.u32 8388608, %v55_v17 }
  0x25   :  { %v58_v16 = vadd.s32 1, %v168_v15  ;;  %v96_v40 = vshll.u32 %v56_v20, 8 }
  0x27   :  { %vm59_vm0 = vcmp.gt.s32.totalorder %v58_v16, 0 }
  0x28   :  { %v60_v18 = vsel %vm59_vm0, %v58_v16, 0 }
  0x29   :  { %v62_v19 = vand.u32 31, %v60_v18  ;;  %v61_v21 = vshrl.u32 %v60_v18, 5 }
  0x2b   :  { %v63_v22 = vsub.s32 32, %v62_v19  ;;  %v65_v24 = vshll.u32 %v237_v23, %v62_v19  ;;  %v68_v26 = vshll.u32 %v238_v25, %v62_v19  ;;  %v71_v28 = vshll.u32 %v239_v27, %v62_v19 }
  0x2c   :  { %v74_v30 = vshll.u32 %v240_v29, %v62_v19  ;;  %v77_v32 = vshll.u32 %v241_v31, %v62_v19  ;;  %vm80_vm1 = vcmp.lt.s32.totalorder %v61_v21, 1  ;;  %vm83_vm2 = vcmp.lt.s32.totalorder %v61_v21, 4 }
  0x2d   :  { %v64_v33 = vshrl.u32 %v237_v23, %v63_v22  ;;  %v66_v34 = vshrl.u32 %v238_v25, %v63_v22  ;;  %v69_v35 = vshrl.u32 %v239_v27, %v63_v22  ;;  %v72_v36 = vshrl.u32 %v240_v29, %v63_v22 }
  0x2e   :  { %v75_v37 = vshrl.u32 %v241_v31, %v63_v22  ;;  %v78_v39 = vshrl.u32 %v242_v38, %v63_v22  ;;  %vm81_vm3 = vcmp.lt.s32.totalorder %v61_v21, 2  ;;  %vm82_vm4 = vcmp.lt.s32.totalorder %v61_v21, 3 }
  0x2f   :  { %v67_v41 = vor.u32 %v66_v34, %v65_v24  ;;  %v70_v42 = vor.u32 %v69_v35, %v68_v26  ;;  %v73_v43 = vor.u32 %v72_v36, %v71_v28 }
  0x30   :  { %v76_v44 = vor.u32 %v75_v37, %v74_v30  ;;  %v79_v45 = vor.u32 %v78_v39, %v77_v32 }
  0x31   :  { %v84_v46 = vsel %vm80_vm1, %v64_v33, %v67_v41  ;;  %v85_v47 = vsel %vm83_vm2, %v73_v43, 2102212464  ;;  %v88_v48 = vsel %vm80_vm1, %v67_v41, %v70_v42  ;;  %v92_v49 = vsel %vm80_vm1, %v70_v42, %v73_v43 }
  0x32   :  { %v86_v50 = vsel %vm82_vm4, %v70_v42, %v85_v47  ;;  %v89_v51 = vsel %vm83_vm2, %v76_v44, 920167782  ;;  %v93_v52 = vsel %vm83_vm2, %v79_v45, 1326507024 }
  0x33   :  { %v90_v53 = vsel %vm82_vm4, %v73_v43, %v89_v51  ;;  %v94_v54 = vsel %vm82_vm4, %v76_v44, %v93_v52  ;;  %v87_v55 = vsel %vm81_vm3, %v84_v46, %v86_v50 }
  0x34   :  { %v91_v56 = vsel %vm81_vm3, %v88_v48, %v90_v53  ;;  %v95_v57 = vsel %vm81_vm3, %v92_v49, %v94_v54  ;;  %v103_v62 = vmul.u32 %v96_v40, %v87_v55 }
  0x35   :  { %v280_v58 = vmul.u32.u64.low %v96_v40, %v95_v57  ;;  %v281_v59 = vmul.u32.u64.high %v96_v40, %v95_v57, %v280_v58  ;;  %v283_v60 = vmul.u32.u64.low %v96_v40, %v91_v56  ;;  %v284_v61 = vmul.u32.u64.high %v96_v40, %v91_v56, %v283_v60 }
  0x37   :  { %vm105_vm5 = vc.u32 %v281_v59, %v283_v60  ;;  %v106_v63 = vadd.s32 1, %v284_v61  ;;  %v104_v10 = vadd.s32 %v283_v60, %v281_v59 }
  0x39   :  { %v107_v0 = vsel %vm105_vm5, %v106_v63, %v284_v61 }
  0x3a   :  { %v108_v1 = vadd.s32 %v107_v0, %v103_v62 }
  0x3c   :  { %v109_v2 = vadd.s32 536870912, %v108_v1 }
  0x3e   :  { %v110_v3 = vshrl.u32 %v109_v2, 30 }
  0x40   :  { %v111_v4 = vshll.u32 %v110_v3, 30  ;;  %v134_v24 = vsub.s32 4, %v110_v3 }
  0x42   :  { %v112_v5 = vsub.s32 %v108_v1, %v111_v4  ;;  %v135_v27 = vsel %vm50_vm7, %v134_v24, %v110_v3 }
  0x43   :  { %v137_v30 = vsel %vm49_vm8, 0, %v135_v27 }
  0x44   :  { %v114_v6 = vsub.s32 0, %v112_v5  ;;  %v141_v31 = vadd.s32 3, %v137_v30 }
  0x46   :  { %v169_v7 = vmin.u32 %v114_v6, %v112_v5  ;;  %v142_v32 = vand.u32 3, %v141_v31 }
  0x48   :  { %v116_v8 = vclz %v169_v7  ;;  %vm147_vm9 = vcmp.eq.s32.totalorder %v142_v32, 2  ;;  %vm144_vm10 = vcmp.eq.s32.totalorder %v142_v32, 0  ;;  %vm143_vm11 = vcmp.lt.s32.totalorder %v142_v32, 2 }
  0x4a   :  { %v170_v9 = vadd.s32 4294967294, %v116_v8 }
  0x4c   :  { %vm171_vm6 = vcmp.lt.s32.totalorder %v170_v9, 0 }
  0x4d   :  { %v119_v12 = vsel %vm171_vm6, 0, %v170_v9 }
  0x4e   :  { %v120_v13 = vsub.s32 32, %v119_v12  ;;  %v121_v15 = vshll.u32 %v112_v5, %v119_v12  ;;  %v124_v16 = vsub.s32 4294967266, %v119_v12 }
  0x50   :  { %v122_v17 = vshrl.u32 %v104_v10, %v120_v13  ;;  %v125_v18 = vadd.s32 127, %v124_v16 }
  0x52   :  { %v123_v19 = vor.u32 %v122_v17, %v121_v15  ;;  %v126_v20 = vshll.u32 %v125_v18, 23 }
  0x54   :  { %v127_v21 = vor.u32 4788187, %v126_v20  ;;  %v130_v22 = vcvt.s32.f32 %v123_v19 }
  0x56   :  { %v128_v23 = vand.u32 2147483647, %v127_v21 }
  0x58   :  { %v131_v25 = vmul.f32 %v130_v22, %v128_v23 }
  0x5a   :  { %v132_v26 = vxor.u32 2147483648, %v131_v25 }
  0x5c   :  { %v133_v28 = vsel %vm50_vm7, %v132_v26, %v131_v25 }
  0x5d   :  { %v136_v29 = vsel %vm49_vm8, %v274_v11, %v133_v28 }
  0x5e   :  { %184 = vcosq.f32 %v136_v29 }
  0x5f   :  { %186 = vsinq.f32 %v136_v29 }
  0x68   :  { %v185_v33 = vpop.eup %184 }
  0x69   :  { %v187_v34 = vpop.eup %186  ;;  %v148_v35 = vxor.u32 2147483648, %v185_v33 }
  0x6a   :  { %v145_v36 = vxor.u32 2147483648, %v187_v34 }
  0x6b   :  { %v149_v14 = vsel %vm147_vm9, %v148_v35, %v187_v34 }
  0x6c   :  { %v146_v37 = vsel %vm144_vm10, %v185_v33, %v145_v36 }
  0x6d   :  { %v150_v38 = vsel %vm143_vm11, %v146_v37, %v149_v14 }
  0x6e   :  { %v151_v39 = vsel %vm140_vm12, nan, %v150_v38 }
  0x6f   :  { %152 = vst [vmem:[#allocation5] sm:$0x3] %v151_v39 }
  0x70   :  { %221 = shalt.err (!%p218_p12)
}
  0x71   :  { %s222_s27 = scalar_lea.hbm %s309_s2, 32 }
  0x72   :  { %p223_p13 = scmp.ne.s32.totalorder %s309_s2, %s222_s27  ;;  %p226_p0 = scmp.lt.u32.totalorder %s222_s27, %s309_s2 }
  0x74   :  { %p228_p1 = pnand %p226_p0, %p223_p13 }
  0x76   :  { %231 = shalt.err (!%p228_p1)
}
  0x77   :  { %162 = dma.vmem_to_hbm [thread:$0]  %s160_s1, 32, %s309_s2, [#allocation4]  }
  0x78   :  { %234 = dma.done.wait [#allocation4], 32  }
  0x79   :  { %235 = vsyncadd [#allocation4], 4294967264 }
  0x7a   :  { %166 = vsyncpa [#allocation3], 1 }
  0x7b   :  { %167 = vsyncpa [#allocation4], 1 }

</bundles_post_ra>
